<compile_context>
chip_gen: v7x
topology: tpu7x:2x2x1
jax: 0.10.0
libtpu: 0.0.40
codegen_flags: <defaults>
</compile_context>

<pallas_src>
import functools

import jax
import jax.numpy as jnp
from jax.experimental import pallas as pl
from jax.experimental.pallas import tpu as pltpu

KK = 105
HIDDEN = 2 * KK          # 210 (true hidden width)
OUT = 2 * KK + 2         # 212 (true output width)
HIDDEN_PAD = 256         # lane-dense padded hidden width
OUT_PAD = 256            # lane-dense padded output width


def _round_up(n, m):
    return ((n + m - 1) // m) * m


def _cdiv(a, b):
    return (a + b - 1) // b


def _flap_mlp_kernel(x_ref,
                     w1_ref, b1_ref,
                     w2_ref, b2_ref,
                     w3_ref, b3_ref,
                     w4_ref, b4_ref,
                     o_ref):
    """Fused 4-layer MLP (ReLU on 3 hidden layers) on one (TM, F) batch tile.

    Weights are bf16 (MXU-native); activations are cast to bf16 right before
    each matmul; accumulation and bias-add stay in f32.
    """
    x = x_ref[...].astype(jnp.bfloat16)

    h = jnp.dot(x, w1_ref[...], preferred_element_type=jnp.float32) + b1_ref[...]
    h = jnp.maximum(h, 0.0).astype(jnp.bfloat16)

    h = jnp.dot(h, w2_ref[...], preferred_element_type=jnp.float32) + b2_ref[...]
    h = jnp.maximum(h, 0.0).astype(jnp.bfloat16)

    h = jnp.dot(h, w3_ref[...], preferred_element_type=jnp.float32) + b3_ref[...]
    h = jnp.maximum(h, 0.0).astype(jnp.bfloat16)

    out = jnp.dot(h, w4_ref[...], preferred_element_type=jnp.float32) + b4_ref[...]
    o_ref[...] = out.astype(o_ref.dtype)


def prepare_params(params):
    """Pad weights/biases to lane-dense 256-wide layouts and cast weights to bf16.

    Call this ONCE (e.g. at init / checkpoint load), not per forward call.
    """
    def pad_to(a, rows, cols):
        r, c = a.shape
        return jnp.pad(a, ((0, rows - r), (0, cols - c)))

    in_dim = params["w1"].shape[0]
    return dict(
        w1=pad_to(params["w1"], in_dim, HIDDEN_PAD).astype(jnp.bfloat16),
        b1=pad_to(params["b1"], 1, HIDDEN_PAD).astype(jnp.float32),
        w2=pad_to(params["w2"], HIDDEN_PAD, HIDDEN_PAD).astype(jnp.bfloat16),
        b2=pad_to(params["b2"], 1, HIDDEN_PAD).astype(jnp.float32),
        w3=pad_to(params["w3"], HIDDEN_PAD, HIDDEN_PAD).astype(jnp.bfloat16),
        b3=pad_to(params["b3"], 1, HIDDEN_PAD).astype(jnp.float32),
        w4=pad_to(params["w4"], HIDDEN_PAD, OUT_PAD).astype(jnp.bfloat16),
        b4=pad_to(params["b4"], 1, OUT_PAD).astype(jnp.float32),
    )


def _choose_tiling(B):
    """Return (TM, B_pad).  Single step for small B; >=2 near-waste-free steps otherwise."""
    if B <= 512:
        tm = _round_up(max(B, 8), 8)
        return tm, tm
    n_steps = max(2, _cdiv(B, 512))
    tm = _round_up(_cdiv(B, n_steps), 8)
    return tm, tm * n_steps


@functools.partial(jax.jit, static_argnames=("trim_output",))
def flap_adapter_forward(x, padded_params, trim_output=True):
    """x: [B, input_space] float32.  padded_params: output of prepare_params()."""
    B, F = x.shape
    p = padded_params

    TM, B_pad = _choose_tiling(B)
    if B_pad != B:
        x = jnp.pad(x, ((0, B_pad - B), (0, 0)))

    grid = (B_pad // TM,)

    def const_spec(a):
        # Whole array resident in VMEM; same block index every grid step so
        # the weight DMA happens once and is reused across the batch pipeline.
        return pl.BlockSpec(a.shape, lambda i: (0,) * a.ndim)

    in_specs = [
        pl.BlockSpec((TM, F), lambda i: (i, 0)),            # x tile (F NOT padded)
        const_spec(p["w1"]), const_spec(p["b1"]),
        const_spec(p["w2"]), const_spec(p["b2"]),
        const_spec(p["w3"]), const_spec(p["b3"]),
        const_spec(p["w4"]), const_spec(p["b4"]),
    ]
    out_spec = pl.BlockSpec((TM, OUT_PAD), lambda i: (i, 0))

    out_pad = pl.pallas_call(
        _flap_mlp_kernel,
        out_shape=jax.ShapeDtypeStruct((B_pad, OUT_PAD), jnp.float32),
        grid=grid,
        in_specs=in_specs,
        out_specs=out_spec,
        compiler_params=pltpu.CompilerParams(
            dimension_semantics=("parallel",)),
    )(x, p["w1"], p["b1"], p["w2"], p["b2"],
      p["w3"], p["b3"], p["w4"], p["b4"])

    if trim_output:
        return out_pad[:B, :OUT]
    return out_pad  # padded (B_pad, 256); real data is [:B, :OUT]


def init_params(key, input_space):
    """Deterministic init mimicking torch.nn.Linear (uniform +/- 1/sqrt(fan_in))."""
    sizes = [(input_space, HIDDEN), (HIDDEN, HIDDEN), (HIDDEN, HIDDEN), (HIDDEN, OUT)]
    params = {}
    for i, (fan_in, fan_out) in enumerate(sizes, start=1):
        key, kw, kb = jax.random.split(key, 3)
        bound = 1.0 / jnp.sqrt(jnp.float32(fan_in))
        params[f"w{i}"] = jax.random.uniform(
            kw, (fan_in, fan_out), jnp.float32, -bound, bound)
        # biases kept 2-D [1, fan_out] so they broadcast along sublanes in-kernel
        params[f"b{i}"] = jax.random.uniform(
            kb, (1, fan_out), jnp.float32, -bound, bound)
    return params


def reference_forward(x, params):
    h = jnp.maximum(x @ params["w1"] + params["b1"], 0.0)
    h = jnp.maximum(h @ params["w2"] + params["b2"], 0.0)
    h = jnp.maximum(h @ params["w3"] + params["b3"], 0.0)
    return h @ params["w4"] + params["b4"]


if __name__ == "__main__":
    key = jax.random.PRNGKey(0)
    key, kx, kp = jax.random.split(key, 3)

    batch = 8
    input_space = 32          # small "alls" feature vector
    x = jax.random.normal(kx, (batch, input_space), jnp.float32)

    params = init_params(kp, input_space)
    padded = prepare_params(params)   # one-time pad + bf16 cast (outside forward)

    out = flap_adapter_forward(x, padded)
    out = jax.block_until_ready(out)

    ref = reference_forward(x, params)
    assert out.shape == (batch, OUT), out.shape
    # bf16 matmuls with f32 accumulation: relaxed tolerance vs the f32 reference.
    assert jnp.allclose(out, ref, atol=2e-2, rtol=2e-2), "mismatch vs reference"

    # Also exercise the multi-tile / padded-tail path at a larger batch
    # (B=600 -> 2 grid steps of TM=304, only 8 padded rows).
    key, kx2 = jax.random.split(key)
    x2 = jax.random.normal(kx2, (600, input_space), jnp.float32)
    out2 = jax.block_until_ready(flap_adapter_forward(x2, padded))
    ref2 = reference_forward(x2, params)
    assert out2.shape == (600, OUT), out2.shape
    assert jnp.allclose(out2, ref2, atol=2e-2, rtol=2e-2), "mismatch (tiled) vs reference"

    print("KERNEL_OK")
</pallas_src>

<mosaic_0001>
module attributes {stable_mosaic.version = 11 : i64} {
  func.func @_flap_mlp_kernel(%arg0: i32, %arg1: memref<8x32xf32, #tpu.memory_space<vmem>>, %arg2: memref<32x256xbf16, #tpu.memory_space<vmem>>, %arg3: memref<1x256xf32, #tpu.memory_space<vmem>>, %arg4: memref<256x256xbf16, #tpu.memory_space<vmem>>, %arg5: memref<1x256xf32, #tpu.memory_space<vmem>>, %arg6: memref<256x256xbf16, #tpu.memory_space<vmem>>, %arg7: memref<1x256xf32, #tpu.memory_space<vmem>>, %arg8: memref<256x256xbf16, #tpu.memory_space<vmem>>, %arg9: memref<1x256xf32, #tpu.memory_space<vmem>>, %arg10: memref<8x256xf32, #tpu.memory_space<vmem>>) attributes {dimension_semantics = [#tpu.dimension_semantics<parallel>], iteration_bounds = array<i64: 1>, scalar_prefetch = 0 : i64, scratch_operands = 0 : i64, tpu.core_type = #tpu.core_type<tc>, window_params = [{transform_indices = @transform_0, window_bounds = array<i64: 8, 32>}, {pipeline_mode = #tpu.pipeline_mode<synchronous>, transform_indices = @transform_1, window_bounds = array<i64: 32, 256>}, {pipeline_mode = #tpu.pipeline_mode<synchronous>, transform_indices = @transform_2, window_bounds = array<i64: 1, 256>}, {pipeline_mode = #tpu.pipeline_mode<synchronous>, transform_indices = @transform_3, window_bounds = array<i64: 256, 256>}, {pipeline_mode = #tpu.pipeline_mode<synchronous>, transform_indices = @transform_4, window_bounds = array<i64: 1, 256>}, {pipeline_mode = #tpu.pipeline_mode<synchronous>, transform_indices = @transform_5, window_bounds = array<i64: 256, 256>}, {pipeline_mode = #tpu.pipeline_mode<synchronous>, transform_indices = @transform_6, window_bounds = array<i64: 1, 256>}, {pipeline_mode = #tpu.pipeline_mode<synchronous>, transform_indices = @transform_7, window_bounds = array<i64: 256, 256>}, {pipeline_mode = #tpu.pipeline_mode<synchronous>, transform_indices = @transform_8, window_bounds = array<i64: 1, 256>}, {transform_indices = @transform_9, window_bounds = array<i64: 8, 256>}]} {
    %c0 = arith.constant 0 : index
    %c0_0 = arith.constant 0 : index
    %0 = vector.load %arg1[%c0, %c0_0] : memref<8x32xf32, #tpu.memory_space<vmem>>, vector<8x32xf32>
    %1 = arith.truncf %0 : vector<8x32xf32> to vector<8x32xbf16>
    %c0_1 = arith.constant 0 : index
    %c0_2 = arith.constant 0 : index
    %2 = vector.load %arg2[%c0_1, %c0_2] : memref<32x256xbf16, #tpu.memory_space<vmem>>, vector<32x256xbf16>
    %cst = arith.constant dense<0.000000e+00> : vector<8x256xf32>
    %3 = tpu.matmul %1, %2, %cst {dimension_numbers = #tpu.dot_dimension_numbers<[1], [0], [0], [1], [0, 0, 1, 1], [], []>} : vector<8x32xbf16>, vector<32x256xbf16>, vector<8x256xf32> -> vector<8x256xf32>
    %c0_3 = arith.constant 0 : index
    %c0_4 = arith.constant 0 : index
    %4 = vector.load %arg3[%c0_3, %c0_4] : memref<1x256xf32, #tpu.memory_space<vmem>>, vector<1x256xf32>
    %5 = vector.broadcast %4 : vector<1x256xf32> to vector<8x256xf32>
    %6 = arith.addf %3, %5 : vector<8x256xf32>
    %cst_5 = arith.constant 0.000000e+00 : f32
    %7 = vector.broadcast %cst_5 : f32 to vector<8x256xf32>
    %8 = arith.maximumf %6, %7 : vector<8x256xf32>
    %9 = arith.truncf %8 : vector<8x256xf32> to vector<8x256xbf16>
    %c0_6 = arith.constant 0 : index
    %c0_7 = arith.constant 0 : index
    %10 = vector.load %arg4[%c0_6, %c0_7] : memref<256x256xbf16, #tpu.memory_space<vmem>>, vector<256x256xbf16>
    %cst_8 = arith.constant dense<0.000000e+00> : vector<8x256xf32>
    %11 = tpu.matmul %9, %10, %cst_8 {dimension_numbers = #tpu.dot_dimension_numbers<[1], [0], [0], [1], [0, 0, 1, 1], [], []>} : vector<8x256xbf16>, vector<256x256xbf16>, vector<8x256xf32> -> vector<8x256xf32>
    %c0_9 = arith.constant 0 : index
    %c0_10 = arith.constant 0 : index
    %12 = vector.load %arg5[%c0_9, %c0_10] : memref<1x256xf32, #tpu.memory_space<vmem>>, vector<1x256xf32>
    %13 = vector.broadcast %12 : vector<1x256xf32> to vector<8x256xf32>
    %14 = arith.addf %11, %13 : vector<8x256xf32>
    %cst_11 = arith.constant 0.000000e+00 : f32
    %15 = vector.broadcast %cst_11 : f32 to vector<8x256xf32>
    %16 = arith.maximumf %14, %15 : vector<8x256xf32>
    %17 = arith.truncf %16 : vector<8x256xf32> to vector<8x256xbf16>
    %c0_12 = arith.constant 0 : index
    %c0_13 = arith.constant 0 : index
    %18 = vector.load %arg6[%c0_12, %c0_13] : memref<256x256xbf16, #tpu.memory_space<vmem>>, vector<256x256xbf16>
    %cst_14 = arith.constant dense<0.000000e+00> : vector<8x256xf32>
    %19 = tpu.matmul %17, %18, %cst_14 {dimension_numbers = #tpu.dot_dimension_numbers<[1], [0], [0], [1], [0, 0, 1, 1], [], []>} : vector<8x256xbf16>, vector<256x256xbf16>, vector<8x256xf32> -> vector<8x256xf32>
    %c0_15 = arith.constant 0 : index
    %c0_16 = arith.constant 0 : index
    %20 = vector.load %arg7[%c0_15, %c0_16] : memref<1x256xf32, #tpu.memory_space<vmem>>, vector<1x256xf32>
    %21 = vector.broadcast %20 : vector<1x256xf32> to vector<8x256xf32>
    %22 = arith.addf %19, %21 : vector<8x256xf32>
    %cst_17 = arith.constant 0.000000e+00 : f32
    %23 = vector.broadcast %cst_17 : f32 to vector<8x256xf32>
    %24 = arith.maximumf %22, %23 : vector<8x256xf32>
    %25 = arith.truncf %24 : vector<8x256xf32> to vector<8x256xbf16>
    %c0_18 = arith.constant 0 : index
    %c0_19 = arith.constant 0 : index
    %26 = vector.load %arg8[%c0_18, %c0_19] : memref<256x256xbf16, #tpu.memory_space<vmem>>, vector<256x256xbf16>
    %cst_20 = arith.constant dense<0.000000e+00> : vector<8x256xf32>
    %27 = tpu.matmul %25, %26, %cst_20 {dimension_numbers = #tpu.dot_dimension_numbers<[1], [0], [0], [1], [0, 0, 1, 1], [], []>} : vector<8x256xbf16>, vector<256x256xbf16>, vector<8x256xf32> -> vector<8x256xf32>
    %c0_21 = arith.constant 0 : index
    %c0_22 = arith.constant 0 : index
    %28 = vector.load %arg9[%c0_21, %c0_22] : memref<1x256xf32, #tpu.memory_space<vmem>>, vector<1x256xf32>
    %29 = vector.broadcast %28 : vector<1x256xf32> to vector<8x256xf32>
    %30 = arith.addf %27, %29 : vector<8x256xf32>
    %c0_23 = arith.constant 0 : index
    %c0_24 = arith.constant 0 : index
    %31 = vector.load %arg10[%c0_23, %c0_24] : memref<8x256xf32, #tpu.memory_space<vmem>>, vector<8x256xf32>
    tpu.vector_store %arg10[%c0_23, %c0_24], %30 {strides = array<i32>} : memref<8x256xf32, #tpu.memory_space<vmem>>, vector<8x256xf32>,
    return
  }
  func.func @transform_0(%arg0: i32) -> (i32, i32) {
    %c0_i32 = arith.constant 0 : i32
    %c0_i32_0 = arith.constant 0 : i32
    return %arg0, %c0_i32 : i32, i32
  }
  func.func @transform_1(%arg0: i32) -> (i32, i32) {
    %c0_i32 = arith.constant 0 : i32
    %c0_i32_0 = arith.constant 0 : i32
    %c0_i32_1 = arith.constant 0 : i32
    return %c0_i32, %c0_i32_0 : i32, i32
  }
  func.func @transform_2(%arg0: i32) -> (i32, i32) {
    %c0_i32 = arith.constant 0 : i32
    %c0_i32_0 = arith.constant 0 : i32
    %c0_i32_1 = arith.constant 0 : i32
    return %c0_i32, %c0_i32_0 : i32, i32
  }
  func.func @transform_3(%arg0: i32) -> (i32, i32) {
    %c0_i32 = arith.constant 0 : i32
    %c0_i32_0 = arith.constant 0 : i32
    %c0_i32_1 = arith.constant 0 : i32
    return %c0_i32, %c0_i32_0 : i32, i32
  }
  func.func @transform_4(%arg0: i32) -> (i32, i32) {
    %c0_i32 = arith.constant 0 : i32
    %c0_i32_0 = arith.constant 0 : i32
    %c0_i32_1 = arith.constant 0 : i32
    return %c0_i32, %c0_i32_0 : i32, i32
  }
  func.func @transform_5(%arg0: i32) -> (i32, i32) {
    %c0_i32 = arith.constant 0 : i32
    %c0_i32_0 = arith.constant 0 : i32
    %c0_i32_1 = arith.constant 0 : i32
    return %c0_i32, %c0_i32_0 : i32, i32
  }
  func.func @transform_6(%arg0: i32) -> (i32, i32) {
    %c0_i32 = arith.constant 0 : i32
    %c0_i32_0 = arith.constant 0 : i32
    %c0_i32_1 = arith.constant 0 : i32
    return %c0_i32, %c0_i32_0 : i32, i32
  }
  func.func @transform_7(%arg0: i32) -> (i32, i32) {
    %c0_i32 = arith.constant 0 : i32
    %c0_i32_0 = arith.constant 0 : i32
    %c0_i32_1 = arith.constant 0 : i32
    return %c0_i32, %c0_i32_0 : i32, i32
  }
  func.func @transform_8(%arg0: i32) -> (i32, i32) {
    %c0_i32 = arith.constant 0 : i32
    %c0_i32_0 = arith.constant 0 : i32
    %c0_i32_1 = arith.constant 0 : i32
    return %c0_i32, %c0_i32_0 : i32, i32
  }
  func.func @transform_9(%arg0: i32) -> (i32, i32) {
    %c0_i32 = arith.constant 0 : i32
    %c0_i32_0 = arith.constant 0 : i32
    return %arg0, %c0_i32 : i32, i32
  }
}

</mosaic_0001>

<bundles_post_ra>
// kernel: flap_adapter_forward.1
= control target key start
LH: loop header
LB: loop body
LE: loop exit
PB: predicated region body
PF: predicated region fallthrough
CT: control target
= control target key end

     0   :  { %14 = vsyncpa [#allocation3], 0  ;;  %s1516_s0 = inlined_call_operand.hbm [shape: f32[8,32], index: 0, kind: input, shape index: {}]   ;;  %s1517_s1 = inlined_call_operand.hbm [shape: bf16[32,256], index: 1, kind: input, shape index: {}]   ;;  %s1518_s2 = inlined_call_operand.vmem [shape: f32[1,256], index: 2, kind: input, shape index: {}]   ;;  %s1519_s3 = inlined_call_operand.hbm [shape: bf16[256,256], index: 3, kind: input, shape index: {}]   ;;  %s1520_s4 = inlined_call_operand.vmem [shape: f32[1,256], index: 4, kind: input, shape index: {}]   ;;  %s1521_s5 = inlined_call_operand.hbm [shape: bf16[256,256], index: 5, kind: input, shape index: {}]   ;;  %s1522_s6 = inlined_call_operand.vmem [shape: f32[1,256], index: 6, kind: input, shape index: {}]   ;;  %s1523_s7 = inlined_call_operand.hbm [shape: bf16[256,256], index: 7, kind: input, shape index: {}]   ;;  %s1524_s8 = inlined_call_operand.vmem [shape: f32[1,256], index: 8, kind: input, shape index: {}]   ;;  %s1525_s9 = inlined_call_operand.hbm [shape: f32[8,256], index: 9, kind: output, shape index: {}]  }
   0x1   :  { %15 = vsyncpa [#allocation6], 0 }
   0x2   :  { %16 = vsyncpa [#allocation9], 0 }
   0x3   :  { %17 = vsyncpa [#allocation4], 0  ;;  %s1349_s30 = smov [#allocation5]   ;;  %s1209_s13 = scalar_lea.hbm %s1517_s1, 512 }
   0x4   :  { %s33_s10 = sshll.u32 %s1349_s30, 4  ;;  %p1210_p0 = scmp.ne.s32.totalorder %s1517_s1, %s1209_s13  ;;  %s34_s10 = int_to_ptr.vmem [resolvable:$true] %s33_s10 }
   0x5   :  { %p1213_p1 = scmp.lt.u32.totalorder %s1209_s13, %s1517_s1 }
   0x7   :  { %p1215_p2 = pnand %p1213_p1, %p1210_p0 }
   0x9   :  { %1218 = shalt.err (!%p1215_p2)
}
   0xa   :  { %s1219_s18 = scalar_lea.vmem %s34_s10, 512  ;;  %p1224_p4 = scmp.lt.s32.totalorder %s34_s10, %s34_s10 }
   0xb   :  { %p1220_p3 = scmp.ne.s32.totalorder %s34_s10, %s1219_s18  ;;  %p1225_p5 = scmp.lt.s32.totalorder %s1219_s18, %s1219_s18 }
   0xd   :  { %p1226_p6 = por %p1225_p5, %p1224_p4 }
   0xf   :  { %p1227_p7 = pnand %p1226_p6, %p1220_p3 }
  0x11   :  { %1230 = shalt.err (!%p1227_p7)
}
  0x12   :  { %s1350_s19 = smov 128   ;;  %s1351_s20 = smov 8  }
  0x13   :  { %39 = dma.hbm_to_vmem [thread:$0]  %s1517_s1, 512, %s34_s10, [#allocation6], %s1350_s19, %s1350_s19, %s1351_s20  }
  0x14   :  { %s1352_s23 = smov [#allocation8]   ;;  %s1353_s25 = smov [#allocation2]  }
  0x15   :  { %s61_s24 = sshll.u32 %s1352_s23, 4  ;;  %s24_s26 = sshll.u32 %s1353_s25, 4  ;;  %s62_s24 = int_to_ptr.vmem [resolvable:$true] %s61_s24  ;;  %s25_s26 = int_to_ptr.vmem [resolvable:$true] %s24_s26 }
  0x16   :  { %s1231_s29 = scalar_lea.hbm %s1521_s5, 4096 }
  0x17   :  { %p1232_p8 = scmp.ne.s32.totalorder %s1521_s5, %s1231_s29  ;;  %p1235_p9 = scmp.lt.u32.totalorder %s1231_s29, %s1521_s5 }
  0x19   :  { %p1237_p10 = pnand %p1235_p9, %p1232_p8 }
  0x1b   :  { %1240 = shalt.err (!%p1237_p10)
}
  0x1c   :  { %s1241_s1 = scalar_lea.vmem %s62_s24, 4096  ;;  %p1246_p12 = scmp.lt.s32.totalorder %s62_s24, %s62_s24 }
  0x1d   :  { %p1242_p11 = scmp.ne.s32.totalorder %s62_s24, %s1241_s1  ;;  %p1247_p13 = scmp.lt.s32.totalorder %s1241_s1, %s1241_s1 }
  0x1f   :  { %p1248_p0 = por %p1247_p13, %p1246_p12 }
  0x21   :  { %p1249_p1 = pnand %p1248_p0, %p1242_p11 }
  0x23   :  { %1252 = shalt.err (!%p1249_p1)
}
  0x24   :  { %67 = dma.hbm_to_vmem [thread:$0]  %s1521_s5, 4096, %s62_s24, [#allocation9], %s1350_s19, %s1350_s19, %s1351_s20  }
  0x25   :  { %s1253_s17 = scalar_lea.hbm %s1516_s0, 128 }
  0x26   :  { %p1254_p2 = scmp.ne.s32.totalorder %s1516_s0, %s1253_s17  ;;  %p1257_p3 = scmp.lt.u32.totalorder %s1253_s17, %s1516_s0 }
  0x28   :  { %p1259_p4 = pnand %p1257_p3, %p1254_p2 }
  0x2a   :  { %1262 = shalt.err (!%p1259_p4)
}
  0x2b   :  { %s1263_s25 = scalar_lea.vmem %s25_s26, 128  ;;  %p1268_p6 = scmp.lt.s32.totalorder %s25_s26, %s25_s26 }
  0x2c   :  { %p1264_p5 = scmp.ne.s32.totalorder %s25_s26, %s1263_s25  ;;  %p1269_p7 = scmp.lt.s32.totalorder %s1263_s25, %s1263_s25 }
  0x2e   :  { %p1270_p8 = por %p1269_p7, %p1268_p6 }
  0x30   :  { %p1271_p9 = pnand %p1270_p8, %p1264_p5 }
  0x32   :  { %1274 = shalt.err (!%p1271_p9)
}
  0x33   :  { %27 = dma.hbm_to_vmem [thread:$0]  %s1516_s0, 128, %s25_s26, [#allocation3]  }
  0x34   :  { %s1354_s27 = smov [#allocation7]   ;;  %s1355_s29 = smov [#allocation10]  }
  0x35   :  { %s47_s28 = sshll.u32 %s1354_s27, 4  ;;  %s75_s30 = sshll.u32 %s1355_s29, 4  ;;  %s48_s28 = int_to_ptr.vmem [resolvable:$true] %s47_s28  ;;  %s76_s30 = int_to_ptr.vmem [resolvable:$true] %s75_s30 }
  0x36   :  { %s1275_s13 = scalar_lea.hbm %s1519_s3, 4096 }
  0x37   :  { %p1276_p10 = scmp.ne.s32.totalorder %s1519_s3, %s1275_s13  ;;  %p1279_p11 = scmp.lt.u32.totalorder %s1275_s13, %s1519_s3 }
  0x39   :  { %p1281_p12 = pnand %p1279_p11, %p1276_p10 }
  0x3b   :  { %1284 = shalt.err (!%p1281_p12)
}
  0x3c   :  { %s1285_s0 = scalar_lea.vmem %s48_s28, 4096  ;;  %p1290_p0 = scmp.lt.s32.totalorder %s48_s28, %s48_s28 }
  0x3d   :  { %p1286_p13 = scmp.ne.s32.totalorder %s48_s28, %s1285_s0  ;;  %p1291_p1 = scmp.lt.s32.totalorder %s1285_s0, %s1285_s0 }
  0x3f   :  { %p1292_p2 = por %p1291_p1, %p1290_p0 }
  0x41   :  { %p1293_p3 = pnand %p1292_p2, %p1286_p13 }
  0x43   :  { %1296 = shalt.err (!%p1293_p3)
}
  0x44   :  { %53 = dma.hbm_to_vmem [thread:$0]  %s1519_s3, 4096, %s48_s28, [#allocation6], %s1350_s19, %s1350_s19, %s1351_s20  }
  0x45   :  { %s1297_s21 = scalar_lea.hbm %s1523_s7, 4096 }
  0x46   :  { %p1298_p4 = scmp.ne.s32.totalorder %s1523_s7, %s1297_s21  ;;  %p1301_p5 = scmp.lt.u32.totalorder %s1297_s21, %s1523_s7 }
  0x48   :  { %p1303_p6 = pnand %p1301_p5, %p1298_p4 }
  0x4a   :  { %1306 = shalt.err (!%p1303_p6)
}
  0x4b   :  { %s1307_s24 = scalar_lea.vmem %s76_s30, 4096  ;;  %p1312_p8 = scmp.lt.s32.totalorder %s76_s30, %s76_s30 }
  0x4c   :  { %p1308_p7 = scmp.ne.s32.totalorder %s76_s30, %s1307_s24  ;;  %p1313_p9 = scmp.lt.s32.totalorder %s1307_s24, %s1307_s24 }
  0x4e   :  { %p1314_p10 = por %p1313_p9, %p1312_p8 }
  0x50   :  { %p1315_p11 = pnand %p1314_p10, %p1308_p7 }
  0x52   :  { %1318 = shalt.err (!%p1315_p11)
}
  0x53   :  { %81 = dma.hbm_to_vmem [thread:$0]  %s1523_s7, 4096, %s76_s30, [#allocation9], %s1350_s19, %s1350_s19, %s1351_s20  }
  0x54   :  { %1341 = dma.done.wait [#allocation3], 128  }
  0x55   :  { %1342 = vsyncadd [#allocation3], 4294967168 }
  0x56   :  { %1343 = dma.done.wait [#allocation6], 4608  }
  0x57   :  { %1344 = vsyncadd [#allocation6], 4294962688 }
  0x58   :  { %1345 = dma.done.wait [#allocation9], 8192  }
  0x59   :  { %1346 = vsyncadd [#allocation9], 4294959104  ;;  %v1356_v0 = vmov 0   ;;  %v1059_v1 = vld [vmem:[#allocation5 + $0x4] ss:$8 sps:$4 sm:$0xff]   ;;  %v100_v5 = vld [vmem:[#allocation2] sm:$0xff] }
  0x5a   :  { %174 = vmatprep.mubr.bf16.mxu0 %v1356_v0  ;;  %v1061_v2 = vld [vmem:[#allocation5] ss:$8 sps:$4 sm:$0xff]   ;;  %142 = vmatprep.subr.bf16.mxu0 %v1059_v1  ;;  %v1062_v3 = vld [vmem:[#allocation5 + $0x14] ss:$8 sps:$4 sm:$0xff]   ;;  %v1064_v4 = vld [vmem:[#allocation5 + $0x10] ss:$8 sps:$4 sm:$0xff]   ;;  %v101_v9 = vpack.c.bf16 %v100_v5, %v100_v5 }
  0x5b   :  { %143 = vmatpush1.bf16.msra.mxu0 %v1061_v2  ;;  %v1065_v6 = vld [vmem:[#allocation7 + $0x4] ss:$8 sps:$4 sm:$0xff]   ;;  %v1067_v7 = vld [vmem:[#allocation7] ss:$8 sps:$4 sm:$0xff]   ;;  %v1068_v8 = vld [vmem:[#allocation7 + $0x14] ss:$8 sps:$4 sm:$0xff]  }
  0x5c   :  { %144 = vmatprep.subr.bf16.mxu0 %v1062_v3  ;;  %391 = vmatprep.subr.bf16.mxu1 %v1065_v6  ;;  %v1070_v10 = vld [vmem:[#allocation7 + $0x10] ss:$8 sps:$4 sm:$0xff]   ;;  %vm138_vm0 = vcmask 261120   ;;  %v1071_v11 = vld [vmem:[#allocation7 + $0x24] ss:$8 sps:$4 sm:$0xff]   ;;  %v108_v3 = vlaneseq }
  0x5d   :  { %392 = vmatpush1.bf16.msra.mxu1 %v1067_v7  ;;  %v1073_v12 = vld [vmem:[#allocation7 + $0x20] ss:$8 sps:$4 sm:$0xff]   ;;  %v1074_v13 = vld [vmem:[#allocation7 + $0x34] ss:$8 sps:$4 sm:$0xff]   ;;  %v1076_v14 = vld [vmem:[#allocation7 + $0x30] ss:$8 sps:$4 sm:$0xff]  }
  0x5e   :  { %393 = vmatprep.subr.bf16.mxu1 %v1068_v8  ;;  %v1077_v15 = vld [vmem:[#allocation7 + $0x44] ss:$8 sps:$4 sm:$0xff]   ;;  %v1079_v16 = vld [vmem:[#allocation7 + $0x40] ss:$8 sps:$4 sm:$0xff]   ;;  %v1080_v17 = vld [vmem:[#allocation7 + $0x54] ss:$8 sps:$4 sm:$0xff]  }
  0x5f   :  { %145 = vmatpush1.bf16.msra.mxu0 %v1064_v4  ;;  %v1082_v18 = vld [vmem:[#allocation7 + $0x50] ss:$8 sps:$4 sm:$0xff]   ;;  %v1083_v19 = vld [vmem:[#allocation7 + $0x64] ss:$8 sps:$4 sm:$0xff]   ;;  %v1085_v20 = vld [vmem:[#allocation7 + $0x60] ss:$8 sps:$4 sm:$0xff]  }
  0x60   :  { %v1086_v21 = vld [vmem:[#allocation7 + $0x74] ss:$8 sps:$4 sm:$0xff]   ;;  %v1088_v22 = vld [vmem:[#allocation7 + $0x70] ss:$8 sps:$4 sm:$0xff]   ;;  %v1089_v23 = vld [vmem:[#allocation7 + $0x84] ss:$8 sps:$4 sm:$0xff]  }
  0x61   :  { %394 = vmatpush1.bf16.msra.mxu1 %v1070_v10  ;;  %v1091_v24 = vld [vmem:[#allocation7 + $0x80] ss:$8 sps:$4 sm:$0xff]   ;;  %v1092_v25 = vld [vmem:[#allocation7 + $0x94] ss:$8 sps:$4 sm:$0xff]   ;;  %v1094_v26 = vld [vmem:[#allocation7 + $0x90] ss:$8 sps:$4 sm:$0xff]  }
  0x62   :  { %953 = vmatmul.mubr.msk.bf16.vlgmr.msra.gmra.mrb[0].mxu0 %vm138_vm0, %v101_v9  ;;  %395 = vmatprep.subr.bf16.mxu1 %v1071_v11  ;;  %v1095_v27 = vld [vmem:[#allocation7 + $0xa4] ss:$8 sps:$4 sm:$0xff]   ;;  %v1097_v28 = vld [vmem:[#allocation7 + $0xa0] ss:$8 sps:$4 sm:$0xff]   ;;  %v1098_v29 = vld [vmem:[#allocation7 + $0xb4] ss:$8 sps:$4 sm:$0xff]  }
  0x63   :  { %v1100_v30 = vld [vmem:[#allocation7 + $0xb0] ss:$8 sps:$4 sm:$0xff]   ;;  %v1101_v31 = vld [vmem:[#allocation7 + $0xc4] ss:$8 sps:$4 sm:$0xff]   ;;  %v1103_v32 = vld [vmem:[#allocation7 + $0xc0] ss:$8 sps:$4 sm:$0xff]  }
  0x64   :  { %v1104_v33 = vld [vmem:[#allocation7 + $0xd4] ss:$8 sps:$4 sm:$0xff]   ;;  %v1106_v34 = vld [vmem:[#allocation7 + $0xd0] ss:$8 sps:$4 sm:$0xff]   ;;  %v1107_v35 = vld [vmem:[#allocation7 + $0xe4] ss:$8 sps:$4 sm:$0xff]  }
  0x65   :  { %396 = vmatpush1.bf16.msra.mxu1 %v1073_v12  ;;  %v1109_v36 = vld [vmem:[#allocation7 + $0xe0] ss:$8 sps:$4 sm:$0xff]   ;;  %v1110_v37 = vld [vmem:[#allocation7 + $0xf4] ss:$8 sps:$4 sm:$0xff]   ;;  %v1112_v38 = vld [vmem:[#allocation7 + $0xf0] ss:$8 sps:$4 sm:$0xff]  }
  0x66   :  { %397 = vmatprep.subr.bf16.mxu1 %v1074_v13  ;;  %v1113_v39 = vld [vmem:[#allocation8] ss:$8 sps:$4 sm:$0xff]   ;;  %v1115_v40 = vld [vmem:[#allocation8 + $0x4] ss:$8 sps:$4 sm:$0xff]   ;;  %v1118_v41 = vld [vmem:[#allocation8 + $0x14] ss:$8 sps:$4 sm:$0xff]  }
  0x67   :  { %640 = vmatprep.subr.bf16.mxu0 %v1115_v40  ;;  %v1116_v42 = vld [vmem:[#allocation8 + $0x10] ss:$8 sps:$4 sm:$0xff]   ;;  %v1121_v43 = vld [vmem:[#allocation8 + $0x24] ss:$8 sps:$4 sm:$0xff]   ;;  %v1119_v44 = vld [vmem:[#allocation8 + $0x20] ss:$8 sps:$4 sm:$0xff]  }
  0x68   :  { %641 = vmatpush1.bf16.msra.mxu0 %v1113_v39  ;;  %v1124_v45 = vld [vmem:[#allocation8 + $0x34] ss:$8 sps:$4 sm:$0xff]   ;;  %v1122_v46 = vld [vmem:[#allocation8 + $0x30] ss:$8 sps:$4 sm:$0xff]   ;;  %v1127_v47 = vld [vmem:[#allocation8 + $0x44] ss:$8 sps:$4 sm:$0xff]  }
  0x69   :  { %398 = vmatpush1.bf16.msra.mxu1 %v1076_v14  ;;  %642 = vmatprep.subr.bf16.mxu0 %v1118_v41  ;;  %v1125_v48 = vld [vmem:[#allocation8 + $0x40] ss:$8 sps:$4 sm:$0xff]   ;;  %v1130_v49 = vld [vmem:[#allocation8 + $0x54] ss:$8 sps:$4 sm:$0xff]   ;;  %v1128_v50 = vld [vmem:[#allocation8 + $0x50] ss:$8 sps:$4 sm:$0xff]  }
  0x6a   :  { %399 = vmatprep.subr.bf16.mxu1 %v1077_v15  ;;  %v1133_v51 = vld [vmem:[#allocation8 + $0x64] ss:$8 sps:$4 sm:$0xff]   ;;  %v1131_v52 = vld [vmem:[#allocation8 + $0x60] ss:$8 sps:$4 sm:$0xff]   ;;  %v1136_v53 = vld [vmem:[#allocation8 + $0x74] ss:$8 sps:$4 sm:$0xff]  }
  0x6b   :  { %v1134_v54 = vld [vmem:[#allocation8 + $0x70] ss:$8 sps:$4 sm:$0xff]   ;;  %v1139_v55 = vld [vmem:[#allocation8 + $0x84] ss:$8 sps:$4 sm:$0xff]   ;;  %v1137_v56 = vld [vmem:[#allocation8 + $0x80] ss:$8 sps:$4 sm:$0xff]  }
  0x6c   :  { %643 = vmatpush1.bf16.msra.mxu0 %v1116_v42  ;;  %v1142_v57 = vld [vmem:[#allocation8 + $0x94] ss:$8 sps:$4 sm:$0xff]   ;;  %v1140_v58 = vld [vmem:[#allocation8 + $0x90] ss:$8 sps:$4 sm:$0xff]   ;;  %v1145_v59 = vld [vmem:[#allocation8 + $0xa4] ss:$8 sps:$4 sm:$0xff]  }
  0x6d   :  { %400 = vmatpush1.bf16.msra.mxu1 %v1079_v16  ;;  %644 = vmatprep.subr.bf16.mxu0 %v1121_v43  ;;  %v1143_v60 = vld [vmem:[#allocation8 + $0xa0] ss:$8 sps:$4 sm:$0xff]   ;;  %v1148_v61 = vld [vmem:[#allocation8 + $0xb4] ss:$8 sps:$4 sm:$0xff]   ;;  %v1146_v62 = vld [vmem:[#allocation8 + $0xb0] ss:$8 sps:$4 sm:$0xff]  }
  0x6e   :  { %401 = vmatprep.subr.bf16.mxu1 %v1080_v17  ;;  %v1151_v63 = vld [vmem:[#allocation8 + $0xc4] ss:$8 sps:$4 sm:$0xff]   ;;  %v1149_v0 = vld [vmem:[#allocation8 + $0xc0] ss:$8 sps:$4 sm:$0xff]   ;;  %v1154_v1 = vld [vmem:[#allocation8 + $0xd4] ss:$8 sps:$4 sm:$0xff]  }
  0x6f   :  { %v1152_v2 = vld [vmem:[#allocation8 + $0xd0] ss:$8 sps:$4 sm:$0xff]   ;;  %v109_v4 = vshrl.u32 %v108_v3, 7  ;;  %v1187_v40 = vld [vmem:[#allocation10 + $0x84] ss:$8 sps:$4 sm:$0xff]  }
  0x70   :  { %645 = vmatpush1.bf16.msra.mxu0 %v1119_v44  ;;  %v106_v6 = vld [vmem:[%s1518_s2] sm:$0x3]  ;;  %v1185_v41 = vld [vmem:[#allocation10 + $0x80] ss:$8 sps:$4 sm:$0xff]   ;;  %v1190_v42 = vld [vmem:[#allocation10 + $0x94] ss:$8 sps:$4 sm:$0xff]  }
  0x71   :  { %402 = vmatpush1.bf16.msra.mxu1 %v1082_v18  ;;  %646 = vmatprep.subr.bf16.mxu0 %v1124_v45  ;;  %v1480_v5 = vsub.s32 0, %v109_v4  ;;  %v1485_v7 = vsub.s32 1, %v109_v4  ;;  %v1182_v39 = vld [vmem:[#allocation10 + $0x70] ss:$8 sps:$4 sm:$0xff]   ;;  %v1193_v44 = vld [vmem:[#allocation10 + $0xa4] ss:$8 sps:$4 sm:$0xff]  }
  0x72   :  { %403 = vmatprep.subr.bf16.mxu1 %v1083_v19  ;;  %v1188_v43 = vld [vmem:[#allocation10 + $0x90] ss:$8 sps:$4 sm:$0xff]   ;;  %v1191_v45 = vld [vmem:[#allocation10 + $0xa0] ss:$8 sps:$4 sm:$0xff]   ;;  %v1208_v3 = vld [vmem:[#allocation10 + $0xf4] ss:$8 sps:$4 sm:$0xff]  }
  0x73   :  { %v111_v8 = vrot.slane %v106_v6, %v1480_v5  ;;  %v115_v9 = vrot.slane %v106_v6, %v1485_v7  ;;  %v1206_v4 = vld [vmem:[#allocation10 + $0xf0] ss:$8 sps:$4 sm:$0xff]  }
  0x74   :  { %647 = vmatpush1.bf16.msra.mxu0 %v1122_v46  ;;  %v1196_v46 = vld [vmem:[#allocation10 + $0xb4] ss:$8 sps:$4 sm:$0xff]   ;;  %v468_v6 = vld [vmem:[%s1522_s6] sm:$0x3]  ;;  %s1357_s6 = smov [#allocation11]  }
  0x75   :  { %404 = vmatpush1.bf16.msra.mxu1 %v1085_v20  ;;  %648 = vmatprep.subr.bf16.mxu0 %v1127_v47  ;;  %v1157_v20 = vld [vmem:[#allocation8 + $0xe4] ss:$8 sps:$4 sm:$0xff]   ;;  %v1194_v47 = vld [vmem:[#allocation10 + $0xb0] ss:$8 sps:$4 sm:$0xff]   ;;  %s938_s11 = sshll.u32 %s1357_s6, 4  ;;  %s939_s11 = int_to_ptr.vmem [resolvable:$true] %s938_s11 }
  0x76   :  { %405 = vmatprep.subr.bf16.mxu1 %v1086_v21  ;;  %v1155_v21 = vld [vmem:[#allocation8 + $0xe0] ss:$8 sps:$4 sm:$0xff]   ;;  %s1319_s12 = scalar_lea.vmem %s939_s11, 256  ;;  %p1324_p13 = scmp.lt.s32.totalorder %s939_s11, %s939_s11 }
  0x77   :  { %p1320_p12 = scmp.ne.s32.totalorder %s939_s11, %s1319_s12  ;;  %p1325_p0 = scmp.lt.s32.totalorder %s1319_s12, %s1319_s12 }
  0x78   :  { %649 = vmatpush1.bf16.msra.mxu0 %v1125_v48  ;;  %v1199_v48 = vld [vmem:[#allocation10 + $0xc4] ss:$8 sps:$4 sm:$0xff]  }
  0x79   :  { %406 = vmatpush1.bf16.msra.mxu1 %v1088_v22  ;;  %650 = vmatprep.subr.bf16.mxu0 %v1130_v49  ;;  %v1160_v22 = vld [vmem:[#allocation8 + $0xf4] ss:$8 sps:$4 sm:$0xff]   ;;  %v1197_v49 = vld [vmem:[#allocation10 + $0xc0] ss:$8 sps:$4 sm:$0xff]   ;;  %p1326_p1 = por %p1325_p0, %p1324_p13 }
  0x7a   :  { %407 = vmatprep.subr.bf16.mxu1 %v1089_v23  ;;  %v1158_v23 = vld [vmem:[#allocation8 + $0xf0] ss:$8 sps:$4 sm:$0xff]  }
  0x7b   :  { %p1327_p2 = pnand %p1326_p1, %p1320_p12 }
  0x7c   :  { %651 = vmatpush1.bf16.msra.mxu0 %v1128_v50  ;;  %v1202_v50 = vld [vmem:[#allocation10 + $0xd4] ss:$8 sps:$4 sm:$0xff]  }
  0x7d   :  { %408 = vmatpush1.bf16.msra.mxu1 %v1091_v24  ;;  %652 = vmatprep.subr.bf16.mxu0 %v1133_v51  ;;  %v1161_v24 = vld [vmem:[#allocation10] ss:$8 sps:$4 sm:$0xff]   ;;  %v1200_v51 = vld [vmem:[#allocation10 + $0xd0] ss:$8 sps:$4 sm:$0xff]  }
  0x7e   :  { %409 = vmatprep.subr.bf16.mxu1 %v1092_v25  ;;  %v1163_v25 = vld [vmem:[#allocation10 + $0x4] ss:$8 sps:$4 sm:$0xff]  }
  0x80   :  { %653 = vmatpush1.bf16.msra.mxu0 %v1131_v52  ;;  %v219_v52 = vld [vmem:[%s1520_s4] sm:$0x3] }
  0x81   :  { %410 = vmatpush1.bf16.msra.mxu1 %v1094_v26  ;;  %654 = vmatprep.subr.bf16.mxu0 %v1136_v53  ;;  %v1166_v26 = vld [vmem:[#allocation10 + $0x14] ss:$8 sps:$4 sm:$0xff]   ;;  %v224_v53 = vrot.slane %v219_v52, %v1480_v5 }
  0x82   :  { %411 = vmatprep.subr.bf16.mxu1 %v1095_v27  ;;  %v1164_v27 = vld [vmem:[#allocation10 + $0x10] ss:$8 sps:$4 sm:$0xff]  }
  0x84   :  { %655 = vmatpush1.bf16.msra.mxu0 %v1134_v54  ;;  %v228_v54 = vrot.slane %v219_v52, %v1485_v7 }
  0x85   :  { %412 = vmatpush1.bf16.msra.mxu1 %v1097_v28  ;;  %656 = vmatprep.subr.bf16.mxu0 %v1139_v55  ;;  %v1169_v28 = vld [vmem:[#allocation10 + $0x24] ss:$8 sps:$4 sm:$0xff]  }
  0x86   :  { %413 = vmatprep.subr.bf16.mxu1 %v1098_v29  ;;  %v1167_v29 = vld [vmem:[#allocation10 + $0x20] ss:$8 sps:$4 sm:$0xff]  }
  0x88   :  { %657 = vmatpush1.bf16.msra.mxu0 %v1137_v56 }
  0x89   :  { %414 = vmatpush1.bf16.msra.mxu1 %v1100_v30  ;;  %658 = vmatprep.subr.bf16.mxu0 %v1142_v57  ;;  %v1172_v30 = vld [vmem:[#allocation10 + $0x34] ss:$8 sps:$4 sm:$0xff]  }
  0x8a   :  { %415 = vmatprep.subr.bf16.mxu1 %v1101_v31  ;;  %v1170_v31 = vld [vmem:[#allocation10 + $0x30] ss:$8 sps:$4 sm:$0xff]  }
  0x8c   :  { %659 = vmatpush1.bf16.msra.mxu0 %v1140_v58 }
  0x8d   :  { %416 = vmatpush1.bf16.msra.mxu1 %v1103_v32  ;;  %660 = vmatprep.subr.bf16.mxu0 %v1145_v59  ;;  %v1175_v32 = vld [vmem:[#allocation10 + $0x44] ss:$8 sps:$4 sm:$0xff]  }
  0x8e   :  { %417 = vmatprep.subr.bf16.mxu1 %v1104_v33  ;;  %v1173_v33 = vld [vmem:[#allocation10 + $0x40] ss:$8 sps:$4 sm:$0xff]  }
  0x90   :  { %661 = vmatpush1.bf16.msra.mxu0 %v1143_v60 }
  0x91   :  { %418 = vmatpush1.bf16.msra.mxu1 %v1106_v34  ;;  %662 = vmatprep.subr.bf16.mxu0 %v1148_v61  ;;  %v1178_v34 = vld [vmem:[#allocation10 + $0x54] ss:$8 sps:$4 sm:$0xff]  }
  0x92   :  { %419 = vmatprep.subr.bf16.mxu1 %v1107_v35  ;;  %v1176_v35 = vld [vmem:[#allocation10 + $0x50] ss:$8 sps:$4 sm:$0xff]  }
  0x94   :  { %663 = vmatpush1.bf16.msra.mxu0 %v1146_v62 }
  0x95   :  { %420 = vmatpush1.bf16.msra.mxu1 %v1109_v36  ;;  %664 = vmatprep.subr.bf16.mxu0 %v1151_v63  ;;  %v1181_v36 = vld [vmem:[#allocation10 + $0x64] ss:$8 sps:$4 sm:$0xff]  }
  0x96   :  { %421 = vmatprep.subr.bf16.mxu1 %v1110_v37  ;;  %v1179_v37 = vld [vmem:[#allocation10 + $0x60] ss:$8 sps:$4 sm:$0xff]  }
  0x98   :  { %665 = vmatpush1.bf16.msra.mxu0 %v1149_v0 }
  0x99   :  { %422 = vmatpush1.bf16.msra.mxu1 %v1112_v38  ;;  %666 = vmatprep.subr.bf16.mxu0 %v1154_v1  ;;  %v1184_v38 = vld [vmem:[#allocation10 + $0x74] ss:$8 sps:$4 sm:$0xff]   ;;  %v1205_v1 = vld [vmem:[#allocation10 + $0xe4] ss:$8 sps:$4 sm:$0xff]  }
  0x9a   :  { %889 = vmatprep.subr.bf16.mxu1 %v1163_v25 }
  0x9c   :  { %667 = vmatpush1.bf16.msra.mxu0 %v1152_v2  ;;  %v1203_v2 = vld [vmem:[#allocation10 + $0xe0] ss:$8 sps:$4 sm:$0xff]  }
  0x9d   :  { %668 = vmatprep.subr.bf16.mxu0 %v1157_v20  ;;  %v717_v20 = vld [vmem:[%s1524_s8] sm:$0x3] }
  0xa0   :  { %669 = vmatpush1.bf16.msra.mxu0 %v1155_v21  ;;  %v722_v21 = vrot.slane %v717_v20, %v1480_v5 }
  0xa1   :  { %670 = vmatprep.subr.bf16.mxu0 %v1160_v22  ;;  %v726_v22 = vrot.slane %v717_v20, %v1485_v7 }
  0xa4   :  { %671 = vmatpush1.bf16.msra.mxu0 %v1158_v23 }
 0x135   :  { %v176_v10 = vpop.f32.mrb[0].mxu0 }
 0x136   :  { %v177_v11 = vadd.f32 %v176_v10, %v111_v8  ;;  %v178_v12 = vpop.f32.mrb[1].mxu0  ;;  %v473_v8 = vrot.slane %v468_v6, %v1480_v5 }
 0x137   :  { %v179_v13 = vadd.f32 %v178_v12, %v115_v9  ;;  %v180_v14 = vpop.f32.mrb[2].mxu0  ;;  %v477_v9 = vrot.slane %v468_v6, %v1485_v7 }
 0x138   :  { %v183_v15 = vmax.f32 %v177_v11, 0.0  ;;  %v181_v16 = vpop.f32.mrb[3].mxu0 }
 0x139   :  { %v184_v17 = vmax.f32 %v179_v13, 0.0 }
 0x13a   :  { %v185_v19 = vpack.c.bf16 %v183_v15, %v183_v15 }
 0x13b   :  { %v186_v18 = vpack.c.bf16 %v184_v17, %v184_v17 }
 0x13d   :  { %423 = vmatprep.mubr.bf16.mxu1 %v186_v18 }
 0x13e   :  { %424 = vmatmul.mubr.bf16.vlgmr.msra.gmra.mrb[0].mxu1 %v185_v19 }
 0x13f   :  { %890 = vmatpush1.bf16.msra.mxu1 %v1161_v24 }
 0x140   :  { %891 = vmatprep.subr.bf16.mxu1 %v1166_v26 }
 0x143   :  { %892 = vmatpush1.bf16.msra.mxu1 %v1164_v27 }
 0x144   :  { %893 = vmatprep.subr.bf16.mxu1 %v1169_v28 }
 0x147   :  { %894 = vmatpush1.bf16.msra.mxu1 %v1167_v29 }
 0x148   :  { %895 = vmatprep.subr.bf16.mxu1 %v1172_v30 }
 0x14b   :  { %896 = vmatpush1.bf16.msra.mxu1 %v1170_v31 }
 0x14c   :  { %897 = vmatprep.subr.bf16.mxu1 %v1175_v32 }
 0x14f   :  { %898 = vmatpush1.bf16.msra.mxu1 %v1173_v33 }
 0x150   :  { %899 = vmatprep.subr.bf16.mxu1 %v1178_v34 }
 0x153   :  { %900 = vmatpush1.bf16.msra.mxu1 %v1176_v35 }
 0x154   :  { %901 = vmatprep.subr.bf16.mxu1 %v1181_v36 }
 0x157   :  { %902 = vmatpush1.bf16.msra.mxu1 %v1179_v37 }
 0x158   :  { %903 = vmatprep.subr.bf16.mxu1 %v1184_v38 }
 0x15b   :  { %904 = vmatpush1.bf16.msra.mxu1 %v1182_v39 }
 0x15c   :  { %905 = vmatprep.subr.bf16.mxu1 %v1187_v40 }
 0x15f   :  { %906 = vmatpush1.bf16.msra.mxu1 %v1185_v41 }
 0x160   :  { %907 = vmatprep.subr.bf16.mxu1 %v1190_v42 }
 0x163   :  { %908 = vmatpush1.bf16.msra.mxu1 %v1188_v43 }
 0x164   :  { %909 = vmatprep.subr.bf16.mxu1 %v1193_v44 }
 0x167   :  { %910 = vmatpush1.bf16.msra.mxu1 %v1191_v45 }
 0x168   :  { %911 = vmatprep.subr.bf16.mxu1 %v1196_v46 }
 0x16b   :  { %912 = vmatpush1.bf16.msra.mxu1 %v1194_v47 }
 0x16c   :  { %913 = vmatprep.subr.bf16.mxu1 %v1199_v48 }
 0x16f   :  { %914 = vmatpush1.bf16.msra.mxu1 %v1197_v49 }
 0x170   :  { %915 = vmatprep.subr.bf16.mxu1 %v1202_v50 }
 0x173   :  { %916 = vmatpush1.bf16.msra.mxu1 %v1200_v51 }
 0x174   :  { %917 = vmatprep.subr.bf16.mxu1 %v1205_v1 }
 0x177   :  { %918 = vmatpush1.bf16.msra.mxu1 %v1203_v2 }
 0x178   :  { %919 = vmatprep.subr.bf16.mxu1 %v1208_v3 }
 0x17b   :  { %920 = vmatpush1.bf16.msra.mxu1 %v1206_v4 }
 0x211   :  { %v425_v55 = vpop.f32.mrb[0].mxu1 }
 0x212   :  { %v426_v56 = vadd.f32 %v425_v55, %v224_v53  ;;  %v427_v57 = vpop.f32.mrb[1].mxu1 }
 0x213   :  { %v428_v58 = vadd.f32 %v427_v57, %v228_v54  ;;  %v429_v59 = vpop.f32.mrb[2].mxu1 }
 0x214   :  { %v432_v60 = vmax.f32 %v426_v56, 0.0  ;;  %v430_v61 = vpop.f32.mrb[3].mxu1 }
 0x215   :  { %v433_v62 = vmax.f32 %v428_v58, 0.0 }
 0x216   :  { %v434_v0 = vpack.c.bf16 %v432_v60, %v432_v60 }
 0x217   :  { %v435_v63 = vpack.c.bf16 %v433_v62, %v433_v62 }
 0x219   :  { %672 = vmatprep.mubr.bf16.mxu0 %v435_v63 }
 0x21a   :  { %673 = vmatmul.mubr.bf16.vlgmr.msra.gmra.mrb[4].mxu0 %v434_v0 }
 0x2ed   :  { %v674_v10 = vpop.f32.mrb[4].mxu0 }
 0x2ee   :  { %v675_v11 = vadd.f32 %v674_v10, %v473_v8  ;;  %v676_v12 = vpop.f32.mrb[5].mxu0 }
 0x2ef   :  { %v677_v13 = vadd.f32 %v676_v12, %v477_v9  ;;  %v678_v14 = vpop.f32.mrb[6].mxu0 }
 0x2f0   :  { %v681_v15 = vmax.f32 %v675_v11, 0.0  ;;  %v679_v16 = vpop.f32.mrb[7].mxu0 }
 0x2f1   :  { %v682_v17 = vmax.f32 %v677_v13, 0.0 }
 0x2f2   :  { %v683_v19 = vpack.c.bf16 %v681_v15, %v681_v15 }
 0x2f3   :  { %v684_v18 = vpack.c.bf16 %v682_v17, %v682_v17 }
 0x2f5   :  { %921 = vmatprep.mubr.bf16.mxu1 %v684_v18 }
 0x2f6   :  { %922 = vmatmul.mubr.bf16.vlgmr.msra.gmra.mrb[4].mxu1 %v683_v19 }
 0x3c9   :  { %v923_v23 = vpop.f32.mrb[4].mxu1 }
 0x3ca   :  { %v924_v24 = vadd.f32 %v923_v23, %v722_v21  ;;  %v925_v25 = vpop.f32.mrb[5].mxu1 }
 0x3cb   :  { %v926_v26 = vadd.f32 %v925_v25, %v726_v22  ;;  %v927_v27 = vpop.f32.mrb[6].mxu1 }
 0x3cc   :  { %930 = vst [vmem:[#allocation11] sm:$0xff] %v924_v24  ;;  %v928_v28 = vpop.f32.mrb[7].mxu1 }
 0x3cd   :  { %931 = vst [vmem:[#allocation11 + $0x8] sm:$0xff] %v926_v26 }
 0x3ce   :  { %1330 = shalt.err (!%p1327_p2)
}
 0x3cf   :  { %s1331_s1 = scalar_lea.hbm %s1525_s9, 256 }
 0x3d0   :  { %p1332_p3 = scmp.ne.s32.totalorder %s1525_s9, %s1331_s1  ;;  %p1335_p4 = scmp.lt.u32.totalorder %s1331_s1, %s1525_s9 }
 0x3d2   :  { %p1337_p5 = pnand %p1335_p4, %p1332_p3 }
 0x3d4   :  { %1340 = shalt.err (!%p1337_p5)
}
 0x3d5   :  { %941 = dma.vmem_to_hbm [thread:$0]  %s939_s11, 256, %s1525_s9, [#allocation4]  }
 0x3d6   :  { %1347 = dma.done.wait [#allocation4], 256  }
 0x3d7   :  { %1348 = vsyncadd [#allocation4], 4294967040 }
 0x3d8   :  { %945 = vsyncpa [#allocation3], 1 }
 0x3d9   :  { %946 = vsyncpa [#allocation6], 1 }
 0x3da   :  { %947 = vsyncpa [#allocation9], 1 }
 0x3db   :  { %948 = vsyncpa [#allocation4], 1 }

</bundles_post_ra>
